<compile_context>
chip_gen: v6e
topology: v6e:2x2x1
jax: 0.10.0
libtpu: 0.0.40
codegen_flags: <defaults>
</compile_context>

<pallas_src>
import functools

import jax
import jax.numpy as jnp
from jax.experimental import pallas as pl
from jax.experimental.pallas import tpu as pltpu


# ---------------------------------------------------------------------------
# Kernel
# ---------------------------------------------------------------------------
def _adapool1d_kernel(taps_ref, beta_ref, o_ref):
    """taps_ref: (K, t_r, t_od) f32 window taps; beta_ref: (1, t_od); o_ref: (t_r, t_od)."""
    x = taps_ref[...]                                   # (K, t_r, t_od)
    k = x.shape[0]

    # --- eDSCW pool: exponential Dice-Sorensen-coefficient weighting ---------
    mu = jnp.sum(x, axis=0, keepdims=True) * (1.0 / k)  # window mean        (1, t_r, t_od)
    dice = (2.0 * x * mu) / (x * x + mu * mu)           # exact div: 0/0 -> NaN -> 0 below
    w = jnp.exp(dice)                                   # (K, t_r, t_od)
    edscw = jnp.sum(x * w, axis=0) * pl.reciprocal(jnp.sum(w, axis=0), approx=True)
    edscw = jnp.nan_to_num(edscw)                       # matches torch.nan_to_num

    # --- eM pool (SoftPool): exponential-of-activation weighting -------------
    e = jnp.exp(x)
    em = jnp.sum(x * e, axis=0) * pl.reciprocal(jnp.sum(e, axis=0), approx=True)
    em = jnp.nan_to_num(em)

    # --- beta blend -----------------------------------------------------------
    beta = beta_ref[...]                                # (1, t_od), broadcasts over rows
    o_ref[...] = jnp.nan_to_num(beta * edscw + (1.0 - beta) * em)


# ---------------------------------------------------------------------------
# Wrapper
# ---------------------------------------------------------------------------
def _tile_sizes(n_rows, n_out, k, budget_bytes=4 << 20):
    """Pick (t_r, t_od): lane-dense, (8,128)-legal, and VMEM-friendly on all gens."""
    t_od = n_out if n_out <= 1024 else 1024             # multiple of 128 (or full dim)
    t_r = n_rows if n_rows <= 256 else 256               # multiple of 8   (or full dim)

    def blk_bytes(tr, to):
        return k * tr * to * 4

    # Shrink lanes first (keeps output lane-dense down to 128), then rows, so the
    # double-buffered input block stays within the VMEM budget even for large K.
    while blk_bytes(t_r, t_od) > budget_bytes and t_od > 128 and t_od % 256 == 0:
        t_od //= 2
    while blk_bytes(t_r, t_od) > budget_bytes and t_r > 8 and t_r % 16 == 0:
        t_r //= 2
    return t_r, t_od


def adapool1d(x, beta, kernel_size=2, stride=None, return_mask=False, native=False):
    assert not return_mask, "TODO(synk): return_mask (per-window masks) not implemented"
    assert not native, "TODO(synk): native fused-weighting variant not implemented"
    if stride is None:
        stride = kernel_size
    K = int(kernel_size[0]) if isinstance(kernel_size, (tuple, list)) else int(kernel_size)
    S = int(stride[0]) if isinstance(stride, (tuple, list)) else int(stride)

    x = jnp.asarray(x, dtype=jnp.float32)               # amp custom_fwd(cast_inputs=f32)
    no_batch = x.ndim == 2
    if no_batch:
        x = x[None]
    B, C, D = x.shape
    oD = (D - K) // S + 1
    R = B * C

    beta = jnp.clip(jnp.asarray(beta, dtype=jnp.float32).reshape(-1), 0.0, 1.0)
    assert beta.shape[0] in (1, oD), (
        f"beta shape {beta.shape} must be (1,) or ({oD},)")
    beta2 = (jnp.broadcast_to(beta, (oD,)) if beta.shape[0] == 1 else beta).reshape(1, oD)

    # Window-tap gather: tap k holds x[..., j*S + k] for every output position j.
    # This is ONE fused XLA pass over x shared by both sub-pools.
    # TODO(synk): fold this gather into the kernel once Mosaic supports lane-strided
    # loads (see header note); until then it is the single remaining extra HBM pass.
    x2 = x.reshape(R, D)
    lim = (oD - 1) * S + 1
    taps = jnp.stack(
        [jax.lax.slice(x2, (0, k), (R, k + lim), (1, S)) for k in range(K)], axis=0)
    # taps: (K, R, oD) -- K on a cheap leading axis; (rows, oD) land on (sublane, lane).

    t_r, t_od = _tile_sizes(R, oD, K)
    grid = (pl.cdiv(R, t_r), pl.cdiv(oD, t_od))

    out = pl.pallas_call(
        _adapool1d_kernel,
        out_shape=jax.ShapeDtypeStruct((R, oD), jnp.float32),
        grid_spec=pltpu.PrefetchScalarGridSpec(
            num_scalar_prefetch=0,
            grid=grid,
            in_specs=[
                pl.BlockSpec((K, t_r, t_od), lambda r, j: (0, r, j)),
                pl.BlockSpec((1, t_od), lambda r, j: (0, j)),
            ],
            out_specs=pl.BlockSpec((t_r, t_od), lambda r, j: (r, j)),
        ),
        compiler_params=pltpu.CompilerParams(
            dimension_semantics=("parallel", "parallel"),
            vmem_limit_bytes=32 * 1024 * 1024,
        ),
    )(taps, beta2)

    out = out.reshape(B, C, oD)
    if no_batch:
        out = out[0]
    return out


class AdaPool1d:
    """JAX/Pallas port of the PyTorch AdaPool1d module (forward pass only)."""

    def __init__(self, kernel_size=2, beta=None, stride=None, beta_trainable=True,
                 return_mask=False, native=False):
        if stride is None:
            stride = kernel_size
        self.kernel_size = (int(kernel_size[0]) if isinstance(kernel_size, (tuple, list))
                            else int(kernel_size))
        self.stride = int(stride[0]) if isinstance(stride, (tuple, list)) else int(stride)
        assert beta is not None, "beta must be given (shape (oD,), (1,), int or tuple)"
        if isinstance(beta, int):
            beta = jax.random.normal(jax.random.PRNGKey(0), (beta,), dtype=jnp.float32)
        elif isinstance(beta, tuple):
            beta = jax.random.normal(jax.random.PRNGKey(0), beta, dtype=jnp.float32)
        else:
            beta = jnp.asarray(beta, dtype=jnp.float32)
        self.beta = jnp.clip(beta, 0.0, 1.0)
        self.return_mask = return_mask
        self.native = native
        self._fwd = jax.jit(functools.partial(
            adapool1d, kernel_size=self.kernel_size, stride=self.stride,
            return_mask=self.return_mask, native=self.native))

    def __call__(self, x):
        return self._fwd(x, jnp.clip(self.beta, 0.0, 1.0))


# ---------------------------------------------------------------------------
# Pure-JAX reference (exact division) for a correctness check
# ---------------------------------------------------------------------------
def _reference(x, beta, K, S):
    x = x.astype(jnp.float32)
    B, C, D = x.shape
    oD = (D - K) // S + 1
    taps = jnp.stack([x[:, :, k:k + (oD - 1) * S + 1:S] for k in range(K)], axis=1)
    mu = taps.mean(axis=1, keepdims=True)
    dice = 2.0 * taps * mu / (taps * taps + mu * mu)
    w = jnp.exp(dice)
    edscw = jnp.nan_to_num((taps * w).sum(axis=1) / w.sum(axis=1))
    e = jnp.exp(taps)
    em = jnp.nan_to_num((taps * e).sum(axis=1) / e.sum(axis=1))
    b = jnp.clip(jnp.asarray(beta, jnp.float32).reshape(-1), 0.0, 1.0)
    b = jnp.broadcast_to(b, (oD,)).reshape(1, 1, oD)
    return jnp.nan_to_num(b * edscw + (1.0 - b) * em)


if __name__ == "__main__":
    key = jax.random.PRNGKey(0)
    kx, kb = jax.random.split(key)
    B, C, D, K = 2, 4, 16, 2
    oD = (D - K) // K + 1                                # stride defaults to kernel_size

    x = jax.random.normal(kx, (B, C, D), dtype=jnp.float32)
    beta = jax.random.normal(kb, (oD,), dtype=jnp.float32)

    pool = AdaPool1d(kernel_size=K, beta=beta, stride=None)
    y = jax.block_until_ready(pool(x))

    y_ref = jax.block_until_ready(_reference(x, beta, K, K))
    assert y.shape == (B, C, oD), y.shape
    # Tolerance is relaxed vs. 1e-5 because the kernel normalizes with the EUP
    # approximate reciprocal (pl.reciprocal(..., approx=True)).
    assert jnp.allclose(y, y_ref, atol=3e-3, rtol=3e-3), float(jnp.max(jnp.abs(y - y_ref)))

    print("KERNEL_OK")
</pallas_src>

<mosaic_0001>
module attributes {stable_mosaic.version = 11 : i64} {
  func.func @_adapool1d_kernel(%arg0: i32, %arg1: i32, %arg2: memref<2x8x8xf32, #tpu.memory_space<vmem>>, %arg3: memref<1x8xf32, #tpu.memory_space<vmem>>, %arg4: memref<8x8xf32, #tpu.memory_space<vmem>>) attributes {dimension_semantics = [#tpu.dimension_semantics<parallel>, #tpu.dimension_semantics<parallel>], iteration_bounds = array<i64: 1, 1>, scalar_prefetch = 0 : i64, scratch_operands = 0 : i64, tpu.core_type = #tpu.core_type<tc>, window_params = [{transform_indices = @transform_0, window_bounds = array<i64: 2, 8, 8>}, {transform_indices = @transform_1, window_bounds = array<i64: 1, 8>}, {transform_indices = @transform_2, window_bounds = array<i64: 8, 8>}]} {
    %c0 = arith.constant 0 : index
    %c0_0 = arith.constant 0 : index
    %c0_1 = arith.constant 0 : index
    %0 = vector.load %arg2[%c0, %c0_0, %c0_1] : memref<2x8x8xf32, #tpu.memory_space<vmem>>, vector<2x8x8xf32>
    %cst = arith.constant dense<0.000000e+00> : vector<8x8xf32>
    %1 = vector.multi_reduction <add>, %0, %cst [0] : vector<2x8x8xf32> to vector<8x8xf32>
    %2 = vector.shape_cast %1 : vector<8x8xf32> to vector<1x8x8xf32>
    %cst_2 = arith.constant 5.000000e-01 : f32
    %3 = vector.broadcast %cst_2 : f32 to vector<1x8x8xf32>
    %4 = arith.mulf %2, %3 : vector<1x8x8xf32>
    %cst_3 = arith.constant 2.000000e+00 : f32
    %5 = vector.broadcast %cst_3 : f32 to vector<2x8x8xf32>
    %6 = arith.mulf %5, %0 : vector<2x8x8xf32>
    %7 = vector.broadcast %4 : vector<1x8x8xf32> to vector<2x8x8xf32>
    %8 = arith.mulf %6, %7 : vector<2x8x8xf32>
    %9 = arith.mulf %0, %0 : vector<2x8x8xf32>
    %10 = arith.mulf %4, %4 : vector<1x8x8xf32>
    %11 = vector.broadcast %10 : vector<1x8x8xf32> to vector<2x8x8xf32>
    %12 = arith.addf %9, %11 : vector<2x8x8xf32>
    %13 = arith.divf %8, %12 : vector<2x8x8xf32>
    %14 = math.exp %13 : vector<2x8x8xf32>
    %15 = arith.mulf %0, %14 : vector<2x8x8xf32>
    %cst_4 = arith.constant dense<0.000000e+00> : vector<8x8xf32>
    %16 = vector.multi_reduction <add>, %15, %cst_4 [0] : vector<2x8x8xf32> to vector<8x8xf32>
    %cst_5 = arith.constant dense<0.000000e+00> : vector<8x8xf32>
    %17 = vector.multi_reduction <add>, %14, %cst_5 [0] : vector<2x8x8xf32> to vector<8x8xf32>
    %18 = tpu.reciprocal %17 {approx = true} : vector<8x8xf32> -> vector<8x8xf32>
    %19 = arith.mulf %16, %18 : vector<8x8xf32>
    %20 = arith.cmpf one, %19, %19 : vector<8x8xf32>
    %cst_6 = arith.constant 0.000000e+00 : f32
    %21 = vector.broadcast %cst_6 : f32 to vector<8x8xf32>
    %22 = arith.select %20, %21, %19 : vector<8x8xi1>, vector<8x8xf32>
    %cst_7 = arith.constant 0x7F800000 : f32
    %23 = vector.broadcast %cst_7 : f32 to vector<8x8xf32>
    %24 = arith.cmpf oeq, %22, %23 : vector<8x8xf32>
    %cst_8 = arith.constant 3.40282347E+38 : f32
    %25 = vector.broadcast %cst_8 : f32 to vector<8x8xf32>
    %26 = arith.select %24, %25, %22 : vector<8x8xi1>, vector<8x8xf32>
    %cst_9 = arith.constant 0xFF800000 : f32
    %27 = vector.broadcast %cst_9 : f32 to vector<8x8xf32>
    %28 = arith.cmpf oeq, %26, %27 : vector<8x8xf32>
    %cst_10 = arith.constant -3.40282347E+38 : f32
    %29 = vector.broadcast %cst_10 : f32 to vector<8x8xf32>
    %30 = arith.select %28, %29, %26 : vector<8x8xi1>, vector<8x8xf32>
    %31 = math.exp %0 : vector<2x8x8xf32>
    %32 = arith.mulf %0, %31 : vector<2x8x8xf32>
    %cst_11 = arith.constant dense<0.000000e+00> : vector<8x8xf32>
    %33 = vector.multi_reduction <add>, %32, %cst_11 [0] : vector<2x8x8xf32> to vector<8x8xf32>
    %cst_12 = arith.constant dense<0.000000e+00> : vector<8x8xf32>
    %34 = vector.multi_reduction <add>, %31, %cst_12 [0] : vector<2x8x8xf32> to vector<8x8xf32>
    %35 = tpu.reciprocal %34 {approx = true} : vector<8x8xf32> -> vector<8x8xf32>
    %36 = arith.mulf %33, %35 : vector<8x8xf32>
    %37 = arith.cmpf one, %36, %36 : vector<8x8xf32>
    %cst_13 = arith.constant 0.000000e+00 : f32
    %38 = vector.broadcast %cst_13 : f32 to vector<8x8xf32>
    %39 = arith.select %37, %38, %36 : vector<8x8xi1>, vector<8x8xf32>
    %cst_14 = arith.constant 0x7F800000 : f32
    %40 = vector.broadcast %cst_14 : f32 to vector<8x8xf32>
    %41 = arith.cmpf oeq, %39, %40 : vector<8x8xf32>
    %cst_15 = arith.constant 3.40282347E+38 : f32
    %42 = vector.broadcast %cst_15 : f32 to vector<8x8xf32>
    %43 = arith.select %41, %42, %39 : vector<8x8xi1>, vector<8x8xf32>
    %cst_16 = arith.constant 0xFF800000 : f32
    %44 = vector.broadcast %cst_16 : f32 to vector<8x8xf32>
    %45 = arith.cmpf oeq, %43, %44 : vector<8x8xf32>
    %cst_17 = arith.constant -3.40282347E+38 : f32
    %46 = vector.broadcast %cst_17 : f32 to vector<8x8xf32>
    %47 = arith.select %45, %46, %43 : vector<8x8xi1>, vector<8x8xf32>
    %c0_18 = arith.constant 0 : index
    %c0_19 = arith.constant 0 : index
    %48 = vector.load %arg3[%c0_18, %c0_19] : memref<1x8xf32, #tpu.memory_space<vmem>>, vector<1x8xf32>
    %49 = vector.broadcast %48 : vector<1x8xf32> to vector<8x8xf32>
    %50 = arith.mulf %49, %30 : vector<8x8xf32>
    %cst_20 = arith.constant 1.000000e+00 : f32
    %51 = vector.broadcast %cst_20 : f32 to vector<1x8xf32>
    %52 = arith.subf %51, %48 : vector<1x8xf32>
    %53 = vector.broadcast %52 : vector<1x8xf32> to vector<8x8xf32>
    %54 = arith.mulf %53, %47 : vector<8x8xf32>
    %55 = arith.addf %50, %54 : vector<8x8xf32>
    %56 = arith.cmpf one, %55, %55 : vector<8x8xf32>
    %cst_21 = arith.constant 0.000000e+00 : f32
    %57 = vector.broadcast %cst_21 : f32 to vector<8x8xf32>
    %58 = arith.select %56, %57, %55 : vector<8x8xi1>, vector<8x8xf32>
    %cst_22 = arith.constant 0x7F800000 : f32
    %59 = vector.broadcast %cst_22 : f32 to vector<8x8xf32>
    %60 = arith.cmpf oeq, %58, %59 : vector<8x8xf32>
    %cst_23 = arith.constant 3.40282347E+38 : f32
    %61 = vector.broadcast %cst_23 : f32 to vector<8x8xf32>
    %62 = arith.select %60, %61, %58 : vector<8x8xi1>, vector<8x8xf32>
    %cst_24 = arith.constant 0xFF800000 : f32
    %63 = vector.broadcast %cst_24 : f32 to vector<8x8xf32>
    %64 = arith.cmpf oeq, %62, %63 : vector<8x8xf32>
    %cst_25 = arith.constant -3.40282347E+38 : f32
    %65 = vector.broadcast %cst_25 : f32 to vector<8x8xf32>
    %66 = arith.select %64, %65, %62 : vector<8x8xi1>, vector<8x8xf32>
    %c0_26 = arith.constant 0 : index
    %c0_27 = arith.constant 0 : index
    %67 = vector.load %arg4[%c0_26, %c0_27] : memref<8x8xf32, #tpu.memory_space<vmem>>, vector<8x8xf32>
    tpu.vector_store %arg4[%c0_26, %c0_27], %66 {strides = array<i32>} : memref<8x8xf32, #tpu.memory_space<vmem>>, vector<8x8xf32>,
    return
  }
  func.func @transform_0(%arg0: i32, %arg1: i32) -> (i32, i32, i32) {
    %c0_i32 = arith.constant 0 : i32
    %c0_i32_0 = arith.constant 0 : i32
    return %c0_i32, %arg0, %arg1 : i32, i32, i32
  }
  func.func @transform_1(%arg0: i32, %arg1: i32) -> (i32, i32) {
    %c0_i32 = arith.constant 0 : i32
    %c0_i32_0 = arith.constant 0 : i32
    return %c0_i32, %arg1 : i32, i32
  }
  func.func @transform_2(%arg0: i32, %arg1: i32) -> (i32, i32) {
    %c0_i32 = arith.constant 0 : i32
    return %arg0, %arg1 : i32, i32
  }
}

</mosaic_0001>

<bundles_post_ra>
// kernel: adapool1d.1
= control target key start
LH: loop header
LB: loop body
LE: loop exit
PB: predicated region body
PF: predicated region fallthrough
CT: control target
= control target key end

     0   :  { %vm14_vm0 = vcmask 64512   ;;  %s188_s0 = inlined_call_operand.vmem [shape: f32[2,8,8], index: 0, kind: input, shape index: {}]   ;;  %s189_s1 = inlined_call_operand.vmem [shape: f32[1,8], index: 1, kind: input, shape index: {}]   ;;  %s190_s2 = inlined_call_operand.hbm [shape: f32[8,8], index: 2, kind: output, shape index: {}]  }
   0x1   :  { %v12_v0 = vld [vmem:[%s188_s0] sm:$0xff]  ;;  %v13_v1 = vld [vmem:[%s188_s0 + $0x8] sm:$0xff] }
   0x2   :  { %v15_v2 = vsel %vm14_vm0, %v12_v0, 0.0  ;;  %v16_v3 = vsel %vm14_vm0, %v13_v1, 0.0 }
   0x3   :  { %7 = vsyncpa [#allocation3], 0  ;;  %v17_v4 = vadd.f32 %v16_v3, %v15_v2  ;;  %v52_v5 = vmul.f32 1.442695, %v12_v0  ;;  %v54_v6 = vmul.f32 1.442695, %v13_v1  ;;  %v23_v8 = vmul.f32 %v12_v0, %v12_v0 }
   0x4   :  { %v24_v9 = vmul.f32 %v13_v1, %v13_v1  ;;  %v19_v13 = vmul.f32 2.0, %v12_v0  ;;  %v20_v15 = vmul.f32 2.0, %v13_v1  ;;  %v74_v42 = vlaneseq  ;;  %v72_v47 = vld [vmem:[%s189_s1] sm:$0x1]  ;;  %s149_s1 = smov [#allocation2]  }
   0x5   :  { %v18_v7 = vmul.f32 0.5, %v17_v4  ;;  %111 = vpow2.f32 %v52_v5  ;;  %v80_v51 = vsub.f32 1.0, %v72_v47  ;;  %s102_s14 = sshll.u32 %s149_s1, 4  ;;  %s103_s14 = int_to_ptr.vmem [resolvable:$true] %s102_s14 }
   0x6   :  { %113 = vpow2.f32 %v54_v6  ;;  %v75_v46 = vshrl.u32 %v74_v42, 7  ;;  %s127_s15 = scalar_lea.vmem %s103_s14, 128  ;;  %p132_p1 = scmp.lt.s32.totalorder %s103_s14, %s103_s14 }
   0x7   :  { %v25_v10 = vmul.f32 %v18_v7, %v18_v7  ;;  %v21_v17 = vmul.f32 %v19_v13, %v18_v7  ;;  %v22_v20 = vmul.f32 %v20_v15, %v18_v7  ;;  %p128_p0 = scmp.ne.s32.totalorder %s103_s14, %s127_s15  ;;  %p133_p2 = scmp.lt.s32.totalorder %s127_s15, %s127_s15 }
   0x8   :  { %v76_v50 = vsub.s32 0, %v75_v46 }
   0x9   :  { %v26_v11 = vadd.f32 %v25_v10, %v23_v8  ;;  %v27_v12 = vadd.f32 %v25_v10, %v24_v9  ;;  %p134_p3 = por %p133_p2, %p132_p1 }
   0xa   :  { %v85_v54 = vrot.slane %v80_v51, %v76_v50  ;;  %v77_v57 = vrot.slane %v72_v47, %v76_v50 }
   0xb   :  { %115 = vrcp.f32 %v26_v11  ;;  %p135_p4 = pnand %p134_p3, %p128_p0 }
   0xc   :  { %117 = vrcp.f32 %v27_v12 }
  0x12   :  { %v112_v14 = vpop.eup %111 }
  0x13   :  { %v114_v16 = vpop.eup %113  ;;  %v61_v18 = vsel %vm14_vm0, %v112_v14, 0.0  ;;  %v56_v28 = vmul.f32 %v112_v14, %v12_v0 }
  0x14   :  { %v62_v19 = vsel %vm14_vm0, %v114_v16, 0.0  ;;  %v57_v29 = vmul.f32 %v114_v16, %v13_v1 }
  0x15   :  { %v63_v22 = vadd.f32 %v62_v19, %v61_v18  ;;  %v58_v30 = vsel %vm14_vm0, %v56_v28, 0.0 }
  0x16   :  { %v59_v31 = vsel %vm14_vm0, %v57_v29, 0.0 }
  0x17   :  { %119 = vrcp.f32 %v63_v22  ;;  %v60_v33 = vadd.f32 %v59_v31, %v58_v30 }
  0x18   :  { %v116_v21 = vpop.eup %115 }
  0x19   :  { %v118_v23 = vpop.eup %117  ;;  %v29_v24 = vmul.f32 %v116_v21, %v21_v17 }
  0x1a   :  { %v31_v25 = vmul.f32 %v118_v23, %v22_v20 }
  0x1b   :  { %v32_v26 = vmul.f32 1.442695, %v29_v24 }
  0x1c   :  { %v34_v27 = vmul.f32 1.442695, %v31_v25 }
  0x1d   :  { %121 = vpow2.f32 %v32_v26 }
  0x1e   :  { %123 = vpow2.f32 %v34_v27 }
  0x24   :  { %v120_v32 = vpop.eup %119 }
  0x25   :  { %v65_v39 = vmul.f32 %v120_v32, %v60_v33 }
  0x27   :  { %vm66_vm1 = vcmp.ne.f32.partialorder %v65_v39, %v65_v39 }
  0x28   :  { %v67_v43 = vsel %vm66_vm1, 0.0, %v65_v39 }
  0x29   :  { %vm68_vm2 = vcmp.eq.f32.partialorder %v67_v43, inf }
  0x2a   :  { %v122_v34 = vpop.eup %121  ;;  %v69_v49 = vsel %vm68_vm2, 3.4028235e+38, %v67_v43 }
  0x2b   :  { %v124_v35 = vpop.eup %123  ;;  %v41_v36 = vsel %vm14_vm0, %v122_v34, 0.0  ;;  %v36_v40 = vmul.f32 %v122_v34, %v12_v0  ;;  %vm70_vm3 = vcmp.eq.f32.partialorder %v69_v49, -inf }
  0x2c   :  { %v42_v37 = vsel %vm14_vm0, %v124_v35, 0.0  ;;  %v37_v41 = vmul.f32 %v124_v35, %v13_v1  ;;  %v71_v56 = vsel %vm70_vm3, -3.4028235e+38, %v69_v49 }
  0x2d   :  { %v43_v38 = vadd.f32 %v42_v37, %v41_v36  ;;  %v38_v44 = vsel %vm14_vm0, %v36_v40, 0.0  ;;  %v87_v59 = vmul.f32 %v85_v54, %v71_v56 }
  0x2e   :  { %v39_v45 = vsel %vm14_vm0, %v37_v41, 0.0 }
  0x2f   :  { %125 = vrcp.f32 %v43_v38  ;;  %v40_v48 = vadd.f32 %v39_v45, %v38_v44 }
  0x3c   :  { %v126_v52 = vpop.eup %125 }
  0x3d   :  { %v45_v53 = vmul.f32 %v126_v52, %v40_v48 }
  0x3f   :  { %vm46_vm4 = vcmp.ne.f32.partialorder %v45_v53, %v45_v53 }
  0x40   :  { %v47_v55 = vsel %vm46_vm4, 0.0, %v45_v53 }
  0x41   :  { %vm48_vm5 = vcmp.eq.f32.partialorder %v47_v55, inf }
  0x42   :  { %v49_v58 = vsel %vm48_vm5, 3.4028235e+38, %v47_v55 }
  0x43   :  { %vm50_vm6 = vcmp.eq.f32.partialorder %v49_v58, -inf }
  0x44   :  { %v51_v60 = vsel %vm50_vm6, -3.4028235e+38, %v49_v58 }
  0x45   :  { %v79_v61 = vmul.f32 %v77_v57, %v51_v60 }
  0x47   :  { %v88_v62 = vadd.f32 %v87_v59, %v79_v61 }
  0x49   :  { %vm89_vm7 = vcmp.ne.f32.partialorder %v88_v62, %v88_v62 }
  0x4a   :  { %v90_v63 = vsel %vm89_vm7, 0.0, %v88_v62 }
  0x4b   :  { %vm91_vm8 = vcmp.eq.f32.partialorder %v90_v63, inf }
  0x4c   :  { %v92_v0 = vsel %vm91_vm8, 3.4028235e+38, %v90_v63 }
  0x4d   :  { %vm93_vm9 = vcmp.eq.f32.partialorder %v92_v0, -inf }
  0x4e   :  { %v94_v1 = vsel %vm93_vm9, -3.4028235e+38, %v92_v0 }
  0x4f   :  { %95 = vst.msk [vmem:[#allocation2] sm:$0xff] %vm14_vm0, %v94_v1 }
  0x50   :  { %138 = shalt.err (!%p135_p4)
}
  0x51   :  { %105 = dma.vmem_to_hbm [thread:$0]  %s103_s14, 128, %s190_s2, [#allocation3]  }
  0x52   :  { %147 = dma.done.wait [#allocation3], 128  }
  0x53   :  { %148 = vsyncadd [#allocation3], 4294967168 }
  0x54   :  { %109 = vsyncpa [#allocation3], 1 }

</bundles_post_ra>
